<compile_context>
chip_gen: v5e
topology: v5e:2x2
jax: 0.10.0
libtpu: 0.0.40
codegen_flags: <defaults>
</compile_context>

<pallas_src>
import functools

import jax
import jax.numpy as jnp
import numpy as np
from jax.experimental import pallas as pl
from jax.experimental.pallas import tpu as pltpu


def _make_kernel(B: int, N: int, D: int, M: int, Fp: int,
                 pre_k: int, pre_v: int, input_dim: int):
    """Fused GMSDR cell kernel. One grid-less invocation handles the whole batch."""

    def kernel(inp_ref, hx_ref, ops_ref, wflat_ref, gb_ref, W_ref, b_ref,
               R_ref, attw_ref, attb_ref, out_ref, hxnew_ref, xts_ref, zs_ref):
        f32 = jnp.float32

        # ---------- build the padded, batch-folded feature matrix xT (N, B*Fp) ----------
        # Column layout: col = b*Fp + f, f in [inputs(input_dim) | hx[-1](D) | hx[-2](D) | 0-pad].
        # Pad lanes MUST be zeroed so the diffusion matmul cannot inject NaNs into
        # the (zero-weighted) padded rows of the projection.
        xts_ref[...] = jnp.zeros((N, B * Fp), f32)
        for b in range(B):
            base = b * Fp
            xts_ref[:, base:base + input_dim] = inp_ref[b]                 # (N, input_dim)
            for v in range(pre_v):
                lo = base + input_dim + v * D
                xts_ref[:, lo:lo + D] = hx_ref[b, pre_k - 1 - v]           # (N, D)

        # ---------- graph diffusion: ONE matmul against the identity-prepended stack ----------
        # ops = [I; S; 2S^2-I; adp*S; adp^2*S - S; ...]  -> (M*N, N)
        diff = jnp.dot(ops_ref[...], xts_ref[...],
                       preferred_element_type=f32)                          # (M*N, B*Fp)

        # ---------- gather (b, m) blocks straight into the Z scratch (no concats) ----------
        # Every copy is a (N=16 rows, Fp=128 lanes) aligned block.
        for b in range(B):
            for m in range(M):
                zs_ref[b * N:(b + 1) * N, m * Fp:(m + 1) * Fp] = \
                    diff[m * N:(m + 1) * N, b * Fp:(b + 1) * Fp]

        # ---------- fused gconv projection + leaky_relu + output matmul ----------
        g = jnp.dot(zs_ref[...], wflat_ref[...],
                    preferred_element_type=f32)                             # (B*N, D)
        g = g + gb_ref[...]                                                 # bias_start = 1.0
        conv = jnp.where(g > 0, g, 0.01 * g)                                # F.leaky_relu_
        out1 = jnp.dot(conv, W_ref[...], preferred_element_type=f32)        # (B*N, D)

        # ---------- vectorized attention over the pre_k states ----------
        ns = hx_ref[...] + R_ref[...][None]                                 # (B, pre_k, N, D)
        prod = ns * attw_ref[...][None, None]
        s = jnp.sum(prod, axis=3, keepdims=True)                            # (B, pre_k, N, 1)
        s = jnp.sum(s, axis=2, keepdims=True) + attb_ref[0, 0]              # (B, pre_k, 1, 1)
        smax = jnp.max(s, axis=1, keepdims=True)
        e = jnp.exp(s - smax)                                               # one exp
        den = jnp.sum(e, axis=1, keepdims=True)
        w = e / den                                                         # one divide
        att = jnp.sum(w * ns, axis=1)                                       # (B, N, D)

        # ---------- epilogue: bias via broadcast, outputs written once ----------
        out_bnd = out1.reshape(B, N, D) + b_ref[...] + att                  # (B, N, D)
        out_ref[...] = out_bnd

        # hx_k update produced in-kernel (saves one wrapper concat per step).
        if pre_k > 1:
            hxnew_ref[:, :pre_k - 1] = hx_ref[:, 1:pre_k]
        hxnew_ref[:, pre_k - 1] = out_bnd

    return kernel


def _diffusion_operators(support, adp, K):
    """Precompute the M-1 non-identity diffusion operators (batch independent).

    Mirrors the torch recurrences exactly, INCLUDING the fact that the adaptive
    branch continues from the mutated (x0, x1) pair left by the support loop
    and uses x2 = adp @ x1 - x0 (no 2x factor), as in the GMSDRCell source.
    """
    N = support.shape[0]
    eye = jnp.eye(N, dtype=jnp.float32)
    ops = []
    x0 = eye
    x1 = support @ x0                          # P_1 = S
    ops.append(x1)
    for _ in range(2, K + 1):
        x2 = 2.0 * (support @ x1) - x0         # Chebyshev recurrence
        ops.append(x2)
        x1, x0 = x2, x1
    x1 = adp @ x0                              # continues from mutated x0 (matches torch)
    ops.append(x1)
    for _ in range(2, K + 1):
        x2 = adp @ x1 - x0
        ops.append(x2)
        x1, x0 = x2, x1
    return jnp.concatenate(ops, axis=0)        # ((M-1)*N, N)


def precompute_gmsdr_constants(params, *, input_dim, max_diffusion_step, pre_v):
    """Everything that does not depend on (inputs, hx_k): build ONCE per sequence."""
    N, D = params["b"].shape
    K = max_diffusion_step
    assert K >= 1
    M = 2 * K + 1                              # (num_supports + 1) * K + 1, one support
    F = input_dim + D * pre_v
    Fp = ((F + 127) // 128) * 128              # lane-pad features for aligned layout

    # adaptive adjacency: softmax(relu(nodevec1 @ nodevec2), dim=1)
    adp = jax.nn.softmax(jax.nn.relu(params["nodevec1"] @ params["nodevec2"]), axis=1)

    ops = _diffusion_operators(params["support"], adp, K)                    # ((M-1)*N, N)
    opsALL = jnp.concatenate([jnp.eye(N, dtype=jnp.float32), ops], axis=0)   # (M*N, N)

    # Flattened, zero-padded projection weight (m-major rows): (M*Fp, D).
    WgP = jnp.zeros((M, Fp, D), jnp.float32).at[:, :F, :].set(params["gconv_w"])
    Wflat = WgP.reshape(M * Fp, D)

    return {
        "opsALL": opsALL,
        "Wflat": Wflat,
        "gb": params["gconv_b"].reshape(1, D),
        "W": params["W"],
        "b": params["b"],
        "R": params["R"],
        "attw": params["att_w"],
        "attb": params["att_b"].reshape(1, 1),
    }


def gmsdr_cell_forward(inputs, hx_k, consts, *, input_dim, max_diffusion_step, pre_v):
    """One GMSDR cell step. `consts` comes from precompute_gmsdr_constants (per sequence)."""
    B, pre_k, N, D = hx_k.shape
    K = max_diffusion_step
    M = 2 * K + 1
    F = input_dim + D * pre_v
    Fp = ((F + 127) // 128) * 128

    inp3 = inputs.reshape(B, N, input_dim)     # only remaining per-step wrapper reshape

    kernel = _make_kernel(B, N, D, M, Fp, pre_k, pre_v, input_dim)
    vmem = pl.BlockSpec(memory_space=pltpu.MemorySpace.VMEM)
    smem = pl.BlockSpec(memory_space=pltpu.MemorySpace.SMEM)

    out_bnd, hx_new = pl.pallas_call(
        kernel,
        out_shape=(
            jax.ShapeDtypeStruct((B, N, D), jnp.float32),
            jax.ShapeDtypeStruct((B, pre_k, N, D), jnp.float32),
        ),
        in_specs=[
            vmem,   # inputs      (B, N, input_dim)
            vmem,   # hx_k        (B, pre_k, N, D)
            vmem,   # opsALL      (M*N, N)
            vmem,   # Wflat       (M*Fp, D)
            vmem,   # gconv_b     (1, D)
            vmem,   # W           (D, D)
            vmem,   # b           (N, D)
            vmem,   # R           (pre_k, N, D)
            vmem,   # att_w       (N, D)
            smem,   # att_b       (1, 1) scalar
        ],
        out_specs=(vmem, vmem),
        scratch_shapes=[
            pltpu.VMEM((N, B * Fp), jnp.float32),        # xT   (features, batch-folded)
            pltpu.VMEM((B * N, M * Fp), jnp.float32),    # Z    (gconv feature slab)
        ],
    )(inp3, hx_k, consts["opsALL"], consts["Wflat"], consts["gb"], consts["W"],
      consts["b"], consts["R"], consts["attw"], consts["attb"])

    return out_bnd.reshape(B, N * D), hx_new


def reference_forward(inputs, hx_k, params, *, input_dim, max_diffusion_step, pre_v):
    """Pure-JAX mirror of the PyTorch forward (stack / permute / big matmul path)."""
    B, pre_k, N, D = hx_k.shape
    K = max_diffusion_step
    M = 2 * K + 1
    F = input_dim + D * pre_v

    adp = jax.nn.softmax(jax.nn.relu(params["nodevec1"] @ params["nodevec2"]), axis=1)
    preH = hx_k[:, -1:]
    for i in range(1, pre_v):
        preH = jnp.concatenate([preH, hx_k[:, -(i + 1):-i]], axis=-1)
    preH = preH.reshape(B, N, D * pre_v)
    x_in = jnp.concatenate([inputs.reshape(B, N, input_dim), preH], axis=2)

    x0 = jnp.transpose(x_in, (1, 2, 0)).reshape(N, F * B)
    mats = [x0]
    S = params["support"]
    x1 = S @ x0
    mats.append(x1)
    for _ in range(2, K + 1):
        x2 = 2.0 * (S @ x1) - x0
        mats.append(x2)
        x1, x0 = x2, x1
    x1 = adp @ x0                      # continues from mutated x0 (matches torch)
    mats.append(x1)
    for _ in range(2, K + 1):
        x2 = adp @ x1 - x0
        mats.append(x2)
        x1, x0 = x2, x1

    x = jnp.stack(mats)                                          # (M, N, F*B)
    x = x.reshape(M, N, F, B).transpose(3, 1, 2, 0).reshape(B * N, F * M)
    Wflat = params["gconv_w"].transpose(1, 0, 2).reshape(F * M, D)
    g = x @ Wflat + params["gconv_b"]
    conv = jax.nn.leaky_relu(g, 0.01).reshape(B, N, D)

    new_states = hx_k + params["R"][None]
    x_att = new_states.reshape(B, pre_k, N * D)
    scores = x_att @ params["att_w"].reshape(N * D, 1) + params["att_b"]
    w = jax.nn.softmax(scores, axis=1)
    att = (x_att * w).sum(axis=1).reshape(B, N, D)

    output = conv @ params["W"] + params["b"][None] + att
    hx_new = jnp.concatenate([hx_k[:, 1:], output[:, None]], axis=1)
    return output.reshape(B, N * D), hx_new


if __name__ == "__main__":
    # Small, module-consistent shapes.
    B, N, D = 2, 16, 32          # batch, num_nodes, num_units (rnn_units)
    input_dim = 4
    pre_k, pre_v = 3, 2
    K = 2                        # max_diffusion_step
    M = 2 * K + 1
    F = input_dim + D * pre_v

    key = jax.random.PRNGKey(0)
    ks = jax.random.split(key, 12)

    # TODO(synk): calculate_scaled_laplacian (scipy, sparse COO) is not replicated;
    # a dense deterministic row-normalized support matrix stands in for it.
    A_raw = jnp.abs(jax.random.normal(ks[0], (N, N), jnp.float32)) + jnp.eye(N)
    support = A_raw / jnp.sum(A_raw, axis=1, keepdims=True)

    params = {
        "nodevec1": jax.random.normal(ks[1], (N, 10), jnp.float32),
        "nodevec2": jax.random.normal(ks[2], (10, N), jnp.float32),
        "support": support,
        "gconv_w": 0.1 * jax.random.normal(ks[3], (M, F, D), jnp.float32),
        "gconv_b": jnp.full((D,), 1.0, jnp.float32),      # bias_start = 1.0
        "W": 0.1 * jax.random.normal(ks[4], (D, D), jnp.float32),
        "b": 0.1 * jax.random.normal(ks[5], (N, D), jnp.float32),
        "R": 0.1 * jax.random.normal(ks[6], (pre_k, N, D), jnp.float32),
        "att_w": 0.1 * jax.random.normal(ks[7], (N, D), jnp.float32),
        "att_b": 0.1 * jax.random.normal(ks[10], (1,), jnp.float32),
    }

    inputs = jax.random.normal(ks[8], (B, N * input_dim), jnp.float32)
    hx_k = jax.random.normal(ks[9], (B, pre_k, N, D), jnp.float32)

    # Step-invariant constants: built ONCE per sequence (amortized across steps).
    consts = precompute_gmsdr_constants(
        params, input_dim=input_dim, max_diffusion_step=K, pre_v=pre_v)

    step = jax.jit(functools.partial(gmsdr_cell_forward, input_dim=input_dim,
                                     max_diffusion_step=K, pre_v=pre_v))
    ref = functools.partial(reference_forward, input_dim=input_dim,
                            max_diffusion_step=K, pre_v=pre_v)

    out, hx_new = step(inputs, hx_k, consts)
    out = jax.block_until_ready(out)
    hx_new = jax.block_until_ready(hx_new)

    out_ref, hx_ref = ref(inputs, hx_k, params)
    np.testing.assert_allclose(np.asarray(out), np.asarray(out_ref), rtol=2e-4, atol=2e-4)
    np.testing.assert_allclose(np.asarray(hx_new), np.asarray(hx_ref), rtol=2e-4, atol=2e-4)

    assert out.shape == (B, N * D) and hx_new.shape == (B, pre_k, N, D)
    print("KERNEL_OK")
</pallas_src>

<mosaic_0001>
module attributes {stable_mosaic.version = 11 : i64} {
  func.func @kernel(%arg0: memref<2x16x4xf32, #tpu.memory_space<vmem>>, %arg1: memref<2x3x16x32xf32, #tpu.memory_space<vmem>>, %arg2: memref<80x16xf32, #tpu.memory_space<vmem>>, %arg3: memref<640x32xf32, #tpu.memory_space<vmem>>, %arg4: memref<1x32xf32, #tpu.memory_space<vmem>>, %arg5: memref<32x32xf32, #tpu.memory_space<vmem>>, %arg6: memref<16x32xf32, #tpu.memory_space<vmem>>, %arg7: memref<3x16x32xf32, #tpu.memory_space<vmem>>, %arg8: memref<16x32xf32, #tpu.memory_space<vmem>>, %arg9: memref<1x1xf32, #tpu.memory_space<smem>>, %arg10: memref<2x16x32xf32, #tpu.memory_space<vmem>>, %arg11: memref<2x3x16x32xf32, #tpu.memory_space<vmem>>, %arg12: memref<16x256xf32, #tpu.memory_space<vmem>>, %arg13: memref<32x640xf32, #tpu.memory_space<vmem>>) attributes {dimension_semantics = [], scalar_prefetch = 0 : i64, scratch_operands = 2 : i64, tpu.core_type = #tpu.core_type<tc>} {
    %cst = arith.constant 0.000000e+00 : f32
    %0 = vector.broadcast %cst : f32 to vector<16x256xf32>
    %c0 = arith.constant 0 : index
    %c0_0 = arith.constant 0 : index
    %1 = vector.load %arg12[%c0, %c0_0] : memref<16x256xf32, #tpu.memory_space<vmem>>, vector<16x256xf32>
    tpu.vector_store %arg12[%c0, %c0_0], %0 {strides = array<i32>} : memref<16x256xf32, #tpu.memory_space<vmem>>, vector<16x256xf32>,
    %c0_1 = arith.constant 0 : index
    %c0_2 = arith.constant 0 : index
    %c0_3 = arith.constant 0 : index
    %2 = vector.load %arg0[%c0_1, %c0_2, %c0_3] : memref<2x16x4xf32, #tpu.memory_space<vmem>>, vector<1x16x4xf32>
    %3 = vector.shape_cast %2 : vector<1x16x4xf32> to vector<16x4xf32>
    %c0_4 = arith.constant 0 : index
    %c0_5 = arith.constant 0 : index
    %4 = vector.load %arg12[%c0_4, %c0_5] : memref<16x256xf32, #tpu.memory_space<vmem>>, vector<16x4xf32>
    tpu.vector_store %arg12[%c0_4, %c0_5], %3 {strides = array<i32>} : memref<16x256xf32, #tpu.memory_space<vmem>>, vector<16x4xf32>,
    %c0_6 = arith.constant 0 : index
    %c2 = arith.constant 2 : index
    %c0_7 = arith.constant 0 : index
    %c0_8 = arith.constant 0 : index
    %5 = vector.load %arg1[%c0_6, %c2, %c0_7, %c0_8] : memref<2x3x16x32xf32, #tpu.memory_space<vmem>>, vector<1x1x16x32xf32>
    %6 = vector.shape_cast %5 : vector<1x1x16x32xf32> to vector<16x32xf32>
    %c0_9 = arith.constant 0 : index
    %c4 = arith.constant 4 : index
    %7 = vector.load %arg12[%c0_9, %c4] : memref<16x256xf32, #tpu.memory_space<vmem>>, vector<16x32xf32>
    tpu.vector_store %arg12[%c0_9, %c4], %6 {strides = array<i32>} : memref<16x256xf32, #tpu.memory_space<vmem>>, vector<16x32xf32>,
    %c0_10 = arith.constant 0 : index
    %c1 = arith.constant 1 : index
    %c0_11 = arith.constant 0 : index
    %c0_12 = arith.constant 0 : index
    %8 = vector.load %arg1[%c0_10, %c1, %c0_11, %c0_12] : memref<2x3x16x32xf32, #tpu.memory_space<vmem>>, vector<1x1x16x32xf32>
    %9 = vector.shape_cast %8 : vector<1x1x16x32xf32> to vector<16x32xf32>
    %c0_13 = arith.constant 0 : index
    %c36 = arith.constant 36 : index
    %10 = vector.load %arg12[%c0_13, %c36] : memref<16x256xf32, #tpu.memory_space<vmem>>, vector<16x32xf32>
    tpu.vector_store %arg12[%c0_13, %c36], %9 {strides = array<i32>} : memref<16x256xf32, #tpu.memory_space<vmem>>, vector<16x32xf32>,
    %c1_14 = arith.constant 1 : index
    %c0_15 = arith.constant 0 : index
    %c0_16 = arith.constant 0 : index
    %11 = vector.load %arg0[%c1_14, %c0_15, %c0_16] : memref<2x16x4xf32, #tpu.memory_space<vmem>>, vector<1x16x4xf32>
    %12 = vector.shape_cast %11 : vector<1x16x4xf32> to vector<16x4xf32>
    %c0_17 = arith.constant 0 : index
    %c128 = arith.constant 128 : index
    %13 = vector.load %arg12[%c0_17, %c128] : memref<16x256xf32, #tpu.memory_space<vmem>>, vector<16x4xf32>
    tpu.vector_store %arg12[%c0_17, %c128], %12 {strides = array<i32>} : memref<16x256xf32, #tpu.memory_space<vmem>>, vector<16x4xf32>,
    %c1_18 = arith.constant 1 : index
    %c2_19 = arith.constant 2 : index
    %c0_20 = arith.constant 0 : index
    %c0_21 = arith.constant 0 : index
    %14 = vector.load %arg1[%c1_18, %c2_19, %c0_20, %c0_21] : memref<2x3x16x32xf32, #tpu.memory_space<vmem>>, vector<1x1x16x32xf32>
    %15 = vector.shape_cast %14 : vector<1x1x16x32xf32> to vector<16x32xf32>
    %c0_22 = arith.constant 0 : index
    %c132 = arith.constant 132 : index
    %16 = vector.load %arg12[%c0_22, %c132] : memref<16x256xf32, #tpu.memory_space<vmem>>, vector<16x32xf32>
    tpu.vector_store %arg12[%c0_22, %c132], %15 {strides = array<i32>} : memref<16x256xf32, #tpu.memory_space<vmem>>, vector<16x32xf32>,
    %c1_23 = arith.constant 1 : index
    %c1_24 = arith.constant 1 : index
    %c0_25 = arith.constant 0 : index
    %c0_26 = arith.constant 0 : index
    %17 = vector.load %arg1[%c1_23, %c1_24, %c0_25, %c0_26] : memref<2x3x16x32xf32, #tpu.memory_space<vmem>>, vector<1x1x16x32xf32>
    %18 = vector.shape_cast %17 : vector<1x1x16x32xf32> to vector<16x32xf32>
    %c0_27 = arith.constant 0 : index
    %c164 = arith.constant 164 : index
    %19 = vector.load %arg12[%c0_27, %c164] : memref<16x256xf32, #tpu.memory_space<vmem>>, vector<16x32xf32>
    tpu.vector_store %arg12[%c0_27, %c164], %18 {strides = array<i32>} : memref<16x256xf32, #tpu.memory_space<vmem>>, vector<16x32xf32>,
    %c0_28 = arith.constant 0 : index
    %c0_29 = arith.constant 0 : index
    %20 = vector.load %arg2[%c0_28, %c0_29] : memref<80x16xf32, #tpu.memory_space<vmem>>, vector<80x16xf32>
    %c0_30 = arith.constant 0 : index
    %c0_31 = arith.constant 0 : index
    %21 = vector.load %arg12[%c0_30, %c0_31] : memref<16x256xf32, #tpu.memory_space<vmem>>, vector<16x256xf32>
    %cst_32 = arith.constant dense<0.000000e+00> : vector<80x256xf32>
    %22 = tpu.matmul %20, %21, %cst_32 {dimension_numbers = #tpu.dot_dimension_numbers<[1], [0], [0], [1], [0, 0, 1, 1], [], []>} : vector<80x16xf32>, vector<16x256xf32>, vector<80x256xf32> -> vector<80x256xf32>
    %23 = vector.extract_strided_slice %22 {offsets = [0, 0], sizes = [16, 128], strides = [1, 1]} : vector<80x256xf32> to vector<16x128xf32>
    %c0_33 = arith.constant 0 : index
    %c0_34 = arith.constant 0 : index
    %24 = vector.load %arg13[%c0_33, %c0_34] : memref<32x640xf32, #tpu.memory_space<vmem>>, vector<16x128xf32>
    tpu.vector_store %arg13[%c0_33, %c0_34], %23 {strides = array<i32>} : memref<32x640xf32, #tpu.memory_space<vmem>>, vector<16x128xf32>,
    %25 = vector.extract_strided_slice %22 {offsets = [16, 0], sizes = [16, 128], strides = [1, 1]} : vector<80x256xf32> to vector<16x128xf32>
    %c0_35 = arith.constant 0 : index
    %c128_36 = arith.constant 128 : index
    %26 = vector.load %arg13[%c0_35, %c128_36] : memref<32x640xf32, #tpu.memory_space<vmem>>, vector<16x128xf32>
    tpu.vector_store %arg13[%c0_35, %c128_36], %25 {strides = array<i32>} : memref<32x640xf32, #tpu.memory_space<vmem>>, vector<16x128xf32>,
    %27 = vector.extract_strided_slice %22 {offsets = [32, 0], sizes = [16, 128], strides = [1, 1]} : vector<80x256xf32> to vector<16x128xf32>
    %c0_37 = arith.constant 0 : index
    %c256 = arith.constant 256 : index
    %28 = vector.load %arg13[%c0_37, %c256] : memref<32x640xf32, #tpu.memory_space<vmem>>, vector<16x128xf32>
    tpu.vector_store %arg13[%c0_37, %c256], %27 {strides = array<i32>} : memref<32x640xf32, #tpu.memory_space<vmem>>, vector<16x128xf32>,
    %29 = vector.extract_strided_slice %22 {offsets = [48, 0], sizes = [16, 128], strides = [1, 1]} : vector<80x256xf32> to vector<16x128xf32>
    %c0_38 = arith.constant 0 : index
    %c384 = arith.constant 384 : index
    %30 = vector.load %arg13[%c0_38, %c384] : memref<32x640xf32, #tpu.memory_space<vmem>>, vector<16x128xf32>
    tpu.vector_store %arg13[%c0_38, %c384], %29 {strides = array<i32>} : memref<32x640xf32, #tpu.memory_space<vmem>>, vector<16x128xf32>,
    %31 = vector.extract_strided_slice %22 {offsets = [64, 0], sizes = [16, 128], strides = [1, 1]} : vector<80x256xf32> to vector<16x128xf32>
    %c0_39 = arith.constant 0 : index
    %c512 = arith.constant 512 : index
    %32 = vector.load %arg13[%c0_39, %c512] : memref<32x640xf32, #tpu.memory_space<vmem>>, vector<16x128xf32>
    tpu.vector_store %arg13[%c0_39, %c512], %31 {strides = array<i32>} : memref<32x640xf32, #tpu.memory_space<vmem>>, vector<16x128xf32>,
    %33 = vector.extract_strided_slice %22 {offsets = [0, 128], sizes = [16, 128], strides = [1, 1]} : vector<80x256xf32> to vector<16x128xf32>
    %c16 = arith.constant 16 : index
    %c0_40 = arith.constant 0 : index
    %34 = vector.load %arg13[%c16, %c0_40] : memref<32x640xf32, #tpu.memory_space<vmem>>, vector<16x128xf32>
    tpu.vector_store %arg13[%c16, %c0_40], %33 {strides = array<i32>} : memref<32x640xf32, #tpu.memory_space<vmem>>, vector<16x128xf32>,
    %35 = vector.extract_strided_slice %22 {offsets = [16, 128], sizes = [16, 128], strides = [1, 1]} : vector<80x256xf32> to vector<16x128xf32>
    %c16_41 = arith.constant 16 : index
    %c128_42 = arith.constant 128 : index
    %36 = vector.load %arg13[%c16_41, %c128_42] : memref<32x640xf32, #tpu.memory_space<vmem>>, vector<16x128xf32>
    tpu.vector_store %arg13[%c16_41, %c128_42], %35 {strides = array<i32>} : memref<32x640xf32, #tpu.memory_space<vmem>>, vector<16x128xf32>,
    %37 = vector.extract_strided_slice %22 {offsets = [32, 128], sizes = [16, 128], strides = [1, 1]} : vector<80x256xf32> to vector<16x128xf32>
    %c16_43 = arith.constant 16 : index
    %c256_44 = arith.constant 256 : index
    %38 = vector.load %arg13[%c16_43, %c256_44] : memref<32x640xf32, #tpu.memory_space<vmem>>, vector<16x128xf32>
    tpu.vector_store %arg13[%c16_43, %c256_44], %37 {strides = array<i32>} : memref<32x640xf32, #tpu.memory_space<vmem>>, vector<16x128xf32>,
    %39 = vector.extract_strided_slice %22 {offsets = [48, 128], sizes = [16, 128], strides = [1, 1]} : vector<80x256xf32> to vector<16x128xf32>
    %c16_45 = arith.constant 16 : index
    %c384_46 = arith.constant 384 : index
    %40 = vector.load %arg13[%c16_45, %c384_46] : memref<32x640xf32, #tpu.memory_space<vmem>>, vector<16x128xf32>
    tpu.vector_store %arg13[%c16_45, %c384_46], %39 {strides = array<i32>} : memref<32x640xf32, #tpu.memory_space<vmem>>, vector<16x128xf32>,
    %41 = vector.extract_strided_slice %22 {offsets = [64, 128], sizes = [16, 128], strides = [1, 1]} : vector<80x256xf32> to vector<16x128xf32>
    %c16_47 = arith.constant 16 : index
    %c512_48 = arith.constant 512 : index
    %42 = vector.load %arg13[%c16_47, %c512_48] : memref<32x640xf32, #tpu.memory_space<vmem>>, vector<16x128xf32>
    tpu.vector_store %arg13[%c16_47, %c512_48], %41 {strides = array<i32>} : memref<32x640xf32, #tpu.memory_space<vmem>>, vector<16x128xf32>,
    %c0_49 = arith.constant 0 : index
    %c0_50 = arith.constant 0 : index
    %43 = vector.load %arg13[%c0_49, %c0_50] : memref<32x640xf32, #tpu.memory_space<vmem>>, vector<32x640xf32>
    %c0_51 = arith.constant 0 : index
    %c0_52 = arith.constant 0 : index
    %44 = vector.load %arg3[%c0_51, %c0_52] : memref<640x32xf32, #tpu.memory_space<vmem>>, vector<640x32xf32>
    %cst_53 = arith.constant dense<0.000000e+00> : vector<32x32xf32>
    %45 = tpu.matmul %43, %44, %cst_53 {dimension_numbers = #tpu.dot_dimension_numbers<[1], [0], [0], [1], [0, 0, 1, 1], [], []>} : vector<32x640xf32>, vector<640x32xf32>, vector<32x32xf32> -> vector<32x32xf32>
    %c0_54 = arith.constant 0 : index
    %c0_55 = arith.constant 0 : index
    %46 = vector.load %arg4[%c0_54, %c0_55] : memref<1x32xf32, #tpu.memory_space<vmem>>, vector<1x32xf32>
    %47 = vector.broadcast %46 : vector<1x32xf32> to vector<32x32xf32>
    %48 = arith.addf %45, %47 : vector<32x32xf32>
    %cst_56 = arith.constant 0.000000e+00 : f32
    %49 = vector.broadcast %cst_56 : f32 to vector<32x32xf32>
    %50 = arith.cmpf ogt, %48, %49 : vector<32x32xf32>
    %cst_57 = arith.constant 0.00999999977 : f32
    %51 = vector.broadcast %cst_57 : f32 to vector<32x32xf32>
    %52 = arith.mulf %51, %48 : vector<32x32xf32>
    %53 = arith.select %50, %48, %52 : vector<32x32xi1>, vector<32x32xf32>
    %c0_58 = arith.constant 0 : index
    %c0_59 = arith.constant 0 : index
    %54 = vector.load %arg5[%c0_58, %c0_59] : memref<32x32xf32, #tpu.memory_space<vmem>>, vector<32x32xf32>
    %cst_60 = arith.constant dense<0.000000e+00> : vector<32x32xf32>
    %55 = tpu.matmul %53, %54, %cst_60 {dimension_numbers = #tpu.dot_dimension_numbers<[1], [0], [0], [1], [0, 0, 1, 1], [], []>} : vector<32x32xf32>, vector<32x32xf32>, vector<32x32xf32> -> vector<32x32xf32>
    %c0_61 = arith.constant 0 : index
    %c0_62 = arith.constant 0 : index
    %c0_63 = arith.constant 0 : index
    %c0_64 = arith.constant 0 : index
    %56 = vector.load %arg1[%c0_61, %c0_62, %c0_63, %c0_64] : memref<2x3x16x32xf32, #tpu.memory_space<vmem>>, vector<2x3x16x32xf32>
    %c0_65 = arith.constant 0 : index
    %c0_66 = arith.constant 0 : index
    %c0_67 = arith.constant 0 : index
    %57 = vector.load %arg7[%c0_65, %c0_66, %c0_67] : memref<3x16x32xf32, #tpu.memory_space<vmem>>, vector<3x16x32xf32>
    %58 = vector.shape_cast %57 : vector<3x16x32xf32> to vector<1x3x16x32xf32>
    %59 = vector.broadcast %58 : vector<1x3x16x32xf32> to vector<2x3x16x32xf32>
    %60 = arith.addf %56, %59 : vector<2x3x16x32xf32>
    %c0_68 = arith.constant 0 : index
    %c0_69 = arith.constant 0 : index
    %61 = vector.load %arg8[%c0_68, %c0_69] : memref<16x32xf32, #tpu.memory_space<vmem>>, vector<16x32xf32>
    %62 = vector.shape_cast %61 : vector<16x32xf32> to vector<1x1x16x32xf32>
    %63 = vector.broadcast %62 : vector<1x1x16x32xf32> to vector<2x3x16x32xf32>
    %64 = arith.mulf %60, %63 : vector<2x3x16x32xf32>
    %cst_70 = arith.constant dense<0.000000e+00> : vector<2x3x16xf32>
    %65 = vector.multi_reduction <add>, %64, %cst_70 [3] : vector<2x3x16x32xf32> to vector<2x3x16xf32>
    %66 = vector.shape_cast %65 : vector<2x3x16xf32> to vector<2x3x16x1xf32>
    %cst_71 = arith.constant dense<0.000000e+00> : vector<2x3x1xf32>
    %67 = vector.multi_reduction <add>, %66, %cst_71 [2] : vector<2x3x16x1xf32> to vector<2x3x1xf32>
    %68 = vector.shape_cast %67 : vector<2x3x1xf32> to vector<2x3x1x1xf32>
    %c0_72 = arith.constant 0 : index
    %c0_73 = arith.constant 0 : index
    %69 = memref.load %arg9[%c0_72, %c0_73] : memref<1x1xf32, #tpu.memory_space<smem>>
    %70 = vector.broadcast %69 : f32 to vector<2x3x1x1xf32>
    %71 = arith.addf %68, %70 : vector<2x3x1x1xf32>
    %cst_74 = arith.constant dense<0xFF800000> : vector<2x1x1xf32>
    %72 = vector.multi_reduction <maximumf>, %71, %cst_74 [1] : vector<2x3x1x1xf32> to vector<2x1x1xf32>
    %73 = vector.shape_cast %72 : vector<2x1x1xf32> to vector<2x1x1x1xf32>
    %74 = vector.broadcast %73 : vector<2x1x1x1xf32> to vector<2x3x1x1xf32>
    %75 = arith.subf %71, %74 : vector<2x3x1x1xf32>
    %76 = math.exp %75 : vector<2x3x1x1xf32>
    %cst_75 = arith.constant dense<0.000000e+00> : vector<2x1x1xf32>
    %77 = vector.multi_reduction <add>, %76, %cst_75 [1] : vector<2x3x1x1xf32> to vector<2x1x1xf32>
    %78 = vector.shape_cast %77 : vector<2x1x1xf32> to vector<2x1x1x1xf32>
    %79 = vector.broadcast %78 : vector<2x1x1x1xf32> to vector<2x3x1x1xf32>
    %80 = arith.divf %76, %79 : vector<2x3x1x1xf32>
    %81 = vector.broadcast %80 : vector<2x3x1x1xf32> to vector<2x3x16x32xf32>
    %82 = arith.mulf %81, %60 : vector<2x3x16x32xf32>
    %cst_76 = arith.constant dense<0.000000e+00> : vector<2x16x32xf32>
    %83 = vector.multi_reduction <add>, %82, %cst_76 [1] : vector<2x3x16x32xf32> to vector<2x16x32xf32>
    %84 = vector.shape_cast %55 : vector<32x32xf32> to vector<2x16x32xf32>
    %c0_77 = arith.constant 0 : index
    %c0_78 = arith.constant 0 : index
    %85 = vector.load %arg6[%c0_77, %c0_78] : memref<16x32xf32, #tpu.memory_space<vmem>>, vector<16x32xf32>
    %86 = vector.shape_cast %85 : vector<16x32xf32> to vector<1x16x32xf32>
    %87 = vector.broadcast %86 : vector<1x16x32xf32> to vector<2x16x32xf32>
    %88 = arith.addf %84, %87 : vector<2x16x32xf32>
    %89 = arith.addf %88, %83 : vector<2x16x32xf32>
    %c0_79 = arith.constant 0 : index
    %c0_80 = arith.constant 0 : index
    %c0_81 = arith.constant 0 : index
    %90 = vector.load %arg10[%c0_79, %c0_80, %c0_81] : memref<2x16x32xf32, #tpu.memory_space<vmem>>, vector<2x16x32xf32>
    tpu.vector_store %arg10[%c0_79, %c0_80, %c0_81], %89 {strides = array<i32>} : memref<2x16x32xf32, #tpu.memory_space<vmem>>, vector<2x16x32xf32>,
    %c0_82 = arith.constant 0 : index
    %c1_83 = arith.constant 1 : index
    %c0_84 = arith.constant 0 : index
    %c0_85 = arith.constant 0 : index
    %91 = vector.load %arg1[%c0_82, %c1_83, %c0_84, %c0_85] : memref<2x3x16x32xf32, #tpu.memory_space<vmem>>, vector<2x2x16x32xf32>
    %c0_86 = arith.constant 0 : index
    %c0_87 = arith.constant 0 : index
    %c0_88 = arith.constant 0 : index
    %c0_89 = arith.constant 0 : index
    %92 = vector.load %arg11[%c0_86, %c0_87, %c0_88, %c0_89] : memref<2x3x16x32xf32, #tpu.memory_space<vmem>>, vector<2x2x16x32xf32>
    tpu.vector_store %arg11[%c0_86, %c0_87, %c0_88, %c0_89], %91 {strides = array<i32>} : memref<2x3x16x32xf32, #tpu.memory_space<vmem>>, vector<2x2x16x32xf32>,
    %c0_90 = arith.constant 0 : index
    %c2_91 = arith.constant 2 : index
    %c0_92 = arith.constant 0 : index
    %c0_93 = arith.constant 0 : index
    %93 = vector.load %arg11[%c0_90, %c2_91, %c0_92, %c0_93] : memref<2x3x16x32xf32, #tpu.memory_space<vmem>>, vector<2x1x16x32xf32>
    %94 = vector.shape_cast %93 : vector<2x1x16x32xf32> to vector<2x16x32xf32>
    %95 = vector.shape_cast %89 : vector<2x16x32xf32> to vector<2x1x16x32xf32>
    tpu.vector_store %arg11[%c0_90, %c2_91, %c0_92, %c0_93], %95 {strides = array<i32>} : memref<2x3x16x32xf32, #tpu.memory_space<vmem>>, vector<2x1x16x32xf32>,
    return
  }
}

</mosaic_0001>

<bundles_post_ra>
// kernel: gmsdr_cell_forward.1
= control target key start
LH: loop header
LB: loop body
LE: loop exit
PB: predicated region body
PF: predicated region fallthrough
CT: control target
= control target key end

     0   :  { %s963_s21 = smov 4   ;;  %s964_s24 = smov 36   ;;  %s1622_s0 = inlined_call_operand.vmem [shape: f32[2,16,4], index: 0, kind: input, shape index: {}]   ;;  %s1623_s1 = inlined_call_operand.vmem [shape: f32[2,3,16,32], index: 1, kind: input, shape index: {}]   ;;  %s1624_s2 = inlined_call_operand.vmem [shape: f32[80,16], index: 2, kind: input, shape index: {}]   ;;  %s1625_s3 = inlined_call_operand.vmem [shape: f32[640,32], index: 3, kind: input, shape index: {}]   ;;  %s1626_s4 = inlined_call_operand.vmem [shape: f32[1,32], index: 4, kind: input, shape index: {}]   ;;  %s1627_s5 = inlined_call_operand.vmem [shape: f32[32,32], index: 5, kind: input, shape index: {}]   ;;  %s1628_s6 = inlined_call_operand.vmem [shape: f32[16,32], index: 6, kind: input, shape index: {}]   ;;  %s1629_s7 = inlined_call_operand.vmem [shape: f32[3,16,32], index: 7, kind: input, shape index: {}]   ;;  %s1630_s8 = inlined_call_operand.vmem [shape: f32[16,32], index: 8, kind: input, shape index: {}]   ;;  %s1631_s9 = inlined_call_operand.<no memory space> [shape: f32[1,1], index: 9, kind: input, shape index: {}]   ;;  %s1632_s10 = inlined_call_operand.vmem [shape: f32[2,16,32], index: 10, kind: output, shape index: {0}]   ;;  %s1633_s11 = inlined_call_operand.hbm [shape: f32[2,3,16,32], index: 11, kind: output, shape index: {1}]  }
   0x1   :  { %v1032_v0 = vld [vmem:[%s1623_s1 + $0x28] sm:$0xff]  ;;  %v1037_v1 = vld [vmem:[%s1623_s1 + $0x20] sm:$0xff]  ;;  %v1044_v2 = vld [vmem:[%s1623_s1 + $0x10] sm:$0xff] }
   0x2   :  { %55 = vrot.lane.b32.xlu0 %v1032_v0, %s963_s21  ;;  %53 = vrot.lane.b32.xlu1 %v1037_v1, %s963_s21 }
   0x3   :  { %67 = vrot.lane.b32.xlu2 %v1044_v2, %s964_s24 }
   0x4   :  { %18 = vsyncpa [#allocation6], 0  ;;  %v1050_v3 = vld [vmem:[%s1623_s1 + $0x18] sm:$0xff]  ;;  %v1060_v5 = vld [vmem:[%s1623_s1 + $0x48] sm:$0xff]  ;;  %v965_v8 = vmov 0.0   ;;  %vm45_vm0 = vcmask 31744  }
   0x5   :  { %v1055_v4 = vld [vmem:[%s1623_s1 + $0x58] sm:$0xff]  ;;  %v1068_v6 = vld [vmem:[%s1623_s1 + $0x50] sm:$0xff]  ;;  %v1073_v7 = vld [vmem:[%s1623_s1 + $0x40] sm:$0xff]  ;;  %41 = vst [vmem:[#allocation2 + $0x10] sm:$0xff] %v965_v8  ;;  %vm59_vm1 = vcmask 293920   ;;  %vm73_vm2 = vcmask 556320  }
   0x6   :  { %v44_v9 = vld [vmem:[%s1622_s0 + $0x8] sm:$0xff]  ;;  %39 = vst [vmem:[#allocation2] sm:$0xff] %v965_v8  ;;  %v43_v10 = vld [vmem:[%s1622_s0] sm:$0xff]  ;;  %v857_v11 = vld [vmem:[%s1622_s0 + $0x18] sm:$0xff]  ;;  %vm121_vm3 = vcmask 130048   ;;  %vm531_vm4 = vcmask 261120  }
   0x7   :  { %47 = vst.msk [vmem:[#allocation2 + $0x10] sm:$0xff] %vm45_vm0, %v44_v9  ;;  %v856_v12 = vld [vmem:[%s1622_s0 + $0x10] sm:$0xff]  ;;  %v107_v22 = vld [vmem:[%s1624_s2] sm:$0xff]  ;;  %v108_v26 = vld [vmem:[%s1624_s2 + $0x8] sm:$0xff]  ;;  %s966_s25 = smov [#allocation5]   ;;  %s838_s26 = sshll.u32 %s1633_s11, 4  ;;  %s839_s26 = int_to_ptr.hbm [resolvable:$true] %s838_s26 }
   0x8   :  { %40 = vst [vmem:[#allocation2 + $0x8] sm:$0xff] %v965_v8  ;;  %v109_v27 = vld [vmem:[%s1624_s2 + $0x10] sm:$0xff]  ;;  %v110_v28 = vld [vmem:[%s1624_s2 + $0x18] sm:$0xff]  ;;  %v111_v29 = vld [vmem:[%s1624_s2 + $0x20] sm:$0xff]  ;;  %s968_s29 = smov 8  }
   0x9   :  { %42 = vst [vmem:[#allocation2 + $0x18] sm:$0xff] %v965_v8  ;;  %v112_v30 = vld [vmem:[%s1624_s2 + $0x28] sm:$0xff]  ;;  %v113_v31 = vld [vmem:[%s1624_s2 + $0x30] sm:$0xff]  ;;  %v301_v32 = vld [vmem:[%s1625_s3 + $0x78] sm:$0xff] }
   0xa   :  { %69 = vrot.lane.b32.xlu0 %v1050_v3, %s964_s24  ;;  %88 = vrot.lane.b32.xlu1 %v1055_v4, %s963_s21  ;;  %46 = vst.msk [vmem:[#allocation2] sm:$0xff] %vm45_vm0, %v43_v10  ;;  %v300_v33 = vld [vmem:[%s1625_s3 + $0x70] sm:$0xff]  ;;  %v299_v34 = vld [vmem:[%s1625_s3 + $0x68] sm:$0xff] }
   0xb   :  { %101 = vrot.lane.b32.xlu2 %v1060_v5, %s964_s24  ;;  %80 = vst.msk [vmem:[#allocation2 + $0x18] sm:$0xff] %vm45_vm0, %v857_v11  ;;  %370 = vmatpush.msra.mxu2 %v301_v32  ;;  %v317_v35 = vld [vmem:[%s1625_s3 + $0xf8] sm:$0xff]  ;;  %v316_v36 = vld [vmem:[%s1625_s3 + $0xf0] sm:$0xff]  ;;  %v298_v37 = vld [vmem:[%s1625_s3 + $0x60] sm:$0xff] }
   0xc   :  { %79 = vst.msk [vmem:[#allocation2 + $0x8] sm:$0xff] %vm45_vm0, %v856_v12  ;;  %399 = vmatpush.msra.mxu3 %v317_v35  ;;  %v315_v38 = vld [vmem:[%s1625_s3 + $0xe8] sm:$0xff]  ;;  %v114_v39 = vld [vmem:[%s1624_s2 + $0x38] sm:$0xff]  ;;  %v314_v42 = vld [vmem:[%s1625_s3 + $0xe0] sm:$0xff] }
   0xd   :  { %371 = vmatpush.msra.mxu2 %v300_v33  ;;  %v297_v40 = vld [vmem:[%s1625_s3 + $0x58] sm:$0xff]  ;;  %v296_v43 = vld [vmem:[%s1625_s3 + $0x50] sm:$0xff]  ;;  %v295_v45 = vld [vmem:[%s1625_s3 + $0x48] sm:$0xff] }
   0xe   :  { %400 = vmatpush.msra.mxu3 %v316_v36  ;;  %v1161_v41 = vld [vmem:[%s1625_s3 + $0x278] sm:$0xff]  ;;  %v312_v46 = vld [vmem:[%s1625_s3 + $0xd0] sm:$0xff]  ;;  %v294_v47 = vld [vmem:[%s1625_s3 + $0x40] sm:$0xff] }
   0xf   :  { %372 = vmatpush.msra.mxu2 %v299_v34  ;;  %v313_v44 = vld [vmem:[%s1625_s3 + $0xd8] sm:$0xff]  ;;  %v311_v48 = vld [vmem:[%s1625_s3 + $0xc8] sm:$0xff]  ;;  %v115_v49 = vld [vmem:[%s1624_s2 + $0x40] sm:$0xff] }
  0x10   :  { %401 = vmatpush.msra.mxu3 %v315_v38  ;;  %v293_v50 = vld [vmem:[%s1625_s3 + $0x38] sm:$0xff]  ;;  %v292_v51 = vld [vmem:[%s1625_s3 + $0x30] sm:$0xff]  ;;  %v291_v52 = vld [vmem:[%s1625_s3 + $0x28] sm:$0xff] }
  0x11   :  { %373 = vmatpush.msra.mxu2 %v298_v37  ;;  %v290_v53 = vld [vmem:[%s1625_s3 + $0x20] sm:$0xff]  ;;  %v116_v54 = vld [vmem:[%s1624_s2 + $0x48] sm:$0xff]  ;;  %v289_v55 = vld [vmem:[%s1625_s3 + $0x18] sm:$0xff]  ;;  %s967_s2 = smov 128  }
  0x12   :  { %86 = vrot.lane.b32.xlu0 %v1068_v6, %s963_s21  ;;  %99 = vrot.lane.b32.xlu1 %v1073_v7, %s964_s24  ;;  %v288_v56 = vld [vmem:[%s1625_s3 + $0x10] sm:$0xff]  ;;  %v287_v57 = vld [vmem:[%s1625_s3 + $0x8] sm:$0xff] }
  0x13   :  { %374 = vmatpush.msra.mxu2 %v297_v40  ;;  %402 = vmatpush.msra.mxu3 %v314_v42  ;;  %v286_v58 = vld [vmem:[%s1625_s3] sm:$0xff]  ;;  %v1228_v60 = vld [vmem:[%s1625_s3 + $0x270] sm:$0xff]  ;;  %v309_v61 = vld [vmem:[%s1625_s3 + $0xb8] sm:$0xff] }
  0x14   :  { %v310_v59 = vld [vmem:[%s1625_s3 + $0xc0] sm:$0xff]  ;;  %v333_v62 = vld [vmem:[%s1625_s3 + $0x178] sm:$0xff]  ;;  %v308_v63 = vld [vmem:[%s1625_s3 + $0xb0] sm:$0xff] }
  0x15   :  { %375 = vmatpush.msra.mxu2 %v296_v43  ;;  %403 = vmatpush.msra.mxu3 %v313_v44  ;;  %v332_v8 = vld [vmem:[%s1625_s3 + $0x170] sm:$0xff]  ;;  %v307_v9 = vld [vmem:[%s1625_s3 + $0xa8] sm:$0xff]  ;;  %v306_v12 = vld [vmem:[%s1625_s3 + $0xa0] sm:$0xff] }
  0x16   :  { %v1249_v10 = vld [vmem:[%s1625_s3 + $0x268] sm:$0xff]  ;;  %v346_v32 = vld [vmem:[%s1625_s3 + $0x1e0] sm:$0xff]  ;;  %v321_v33 = vld [vmem:[%s1625_s3 + $0x118] sm:$0xff] }
  0x17   :  { %376 = vmatpush.msra.mxu2 %v295_v45  ;;  %404 = vmatpush.msra.mxu3 %v312_v46  ;;  %v331_v11 = vld [vmem:[%s1625_s3 + $0x168] sm:$0xff]  ;;  %v345_v34 = vld [vmem:[%s1625_s3 + $0x1d8] sm:$0xff]  ;;  %v320_v36 = vld [vmem:[%s1625_s3 + $0x110] sm:$0xff] }
  0x18   :  { %v359_v35 = vld [vmem:[%s1625_s3 + $0x248] sm:$0xff]  ;;  %v344_v37 = vld [vmem:[%s1625_s3 + $0x1d0] sm:$0xff]  ;;  %v358_v40 = vld [vmem:[%s1625_s3 + $0x240] sm:$0xff] }
  0x19   :  { %377 = vmatpush.msra.mxu2 %v294_v47  ;;  %405 = vmatpush.msra.mxu3 %v311_v48  ;;  %v343_v38 = vld [vmem:[%s1625_s3 + $0x1c8] sm:$0xff]  ;;  %v318_v42 = vld [vmem:[%s1625_s3 + $0x100] sm:$0xff]  ;;  %v341_v45 = vld [vmem:[%s1625_s3 + $0x1b8] sm:$0xff] }
  0x1a   :  { %v342_v43 = vld [vmem:[%s1625_s3 + $0x1c0] sm:$0xff]  ;;  %v340_v46 = vld [vmem:[%s1625_s3 + $0x1b0] sm:$0xff]  ;;  %v357_v47 = vld [vmem:[%s1625_s3 + $0x238] sm:$0xff] }
  0x1b   :  { %378 = vmatpush.msra.mxu2 %v293_v50  ;;  %406 = vmatpush.msra.mxu3 %v310_v59  ;;  %v339_v48 = vld [vmem:[%s1625_s3 + $0x1a8] sm:$0xff]  ;;  %v338_v50 = vld [vmem:[%s1625_s3 + $0x1a0] sm:$0xff] }
  0x1c   :  { %v354_v59 = vld [vmem:[%s1625_s3 + $0x220] sm:$0xff] }
  0x1d   :  { %379 = vmatpush.msra.mxu2 %v292_v51  ;;  %407 = vmatpush.msra.mxu3 %v309_v61 }
  0x1f   :  { %380 = vmatpush.msra.mxu2 %v291_v52  ;;  %408 = vmatpush.msra.mxu3 %v308_v63  ;;  %v356_v52 = vld [vmem:[%s1625_s3 + $0x230] sm:$0xff] }
  0x20   :  { %v352_v63 = vld [vmem:[%s1625_s3 + $0x210] sm:$0xff] }
  0x21   :  { %381 = vmatpush.msra.mxu2 %v290_v53  ;;  %409 = vmatpush.msra.mxu3 %v307_v9  ;;  %v336_v53 = vld [vmem:[%s1625_s3 + $0x190] sm:$0xff] }
  0x23   :  { %382 = vmatpush.msra.mxu2 %v289_v55  ;;  %410 = vmatpush.msra.mxu3 %v306_v12  ;;  %v335_v55 = vld [vmem:[%s1625_s3 + $0x188] sm:$0xff] }
  0x25   :  { %383 = vmatpush.msra.mxu2 %v288_v56 }
  0x27   :  { %384 = vmatpush.msra.mxu2 %v287_v57  ;;  %v334_v57 = vld [vmem:[%s1625_s3 + $0x180] sm:$0xff] }
  0x29   :  { %385 = vmatpush.msra.mxu2 %v286_v58 }
  0x2b   :  { %428 = vmatpush.msrb.mxu2 %v333_v62  ;;  %v353_v62 = vld [vmem:[%s1625_s3 + $0x218] sm:$0xff] }
  0x2d   :  { %429 = vmatpush.msrb.mxu2 %v332_v8  ;;  %v351_v8 = vld [vmem:[%s1625_s3 + $0x208] sm:$0xff] }
  0x2f   :  { %430 = vmatpush.msrb.mxu2 %v331_v11 }
  0x5d   :  { %v68_v13 = vpop.permute.xlu2 %67 }
  0x65   :  { %v102_v16 = vpop.permute.xlu2 %101 }
  0x74   :  { %v56_v14 = vpop.permute.xlu0 %55  ;;  %v54_v15 = vpop.permute.xlu1 %53 }
  0x75   :  { %61 = vst.msk [vmem:[#allocation2 + $0x10] sm:$0xff] %vm59_vm1, %v56_v14  ;;  %v305_v14 = vld [vmem:[%s1625_s3 + $0x98] sm:$0xff] }
  0x76   :  { %60 = vst.msk [vmem:[#allocation2] sm:$0xff] %vm59_vm1, %v54_v15  ;;  %v329_v15 = vld [vmem:[%s1625_s3 + $0x158] sm:$0xff]  ;;  %411 = vmatpush.msra.mxu3 %v305_v14 }
  0x77   :  { %74 = vst.msk [vmem:[#allocation2] sm:$0xff] %vm73_vm2, %v68_v13  ;;  %v330_v13 = vld [vmem:[%s1625_s3 + $0x160] sm:$0xff] }
  0x78   :  { %431 = vmatpush.msrb.mxu2 %v330_v13 }
  0x7a   :  { %432 = vmatpush.msrb.mxu2 %v329_v15 }
  0x7c   :  { %v70_v17 = vpop.permute.xlu0 %69  ;;  %v89_v18 = vpop.permute.xlu1 %88 }
  0x7d   :  { %75 = vst.msk [vmem:[#allocation2 + $0x10] sm:$0xff] %vm73_vm2, %v70_v17  ;;  %v304_v17 = vld [vmem:[%s1625_s3 + $0x90] sm:$0xff] }
  0x7e   :  { %93 = vst.msk [vmem:[#allocation2 + $0x18] sm:$0xff] %vm59_vm1, %v89_v18  ;;  %v117_v23 = vld [vmem:[#allocation2] sm:$0xff]  ;;  %v328_v18 = vld [vmem:[%s1625_s3 + $0x150] sm:$0xff]  ;;  %412 = vmatpush.msra.mxu3 %v304_v17 }
  0x7f   :  { %106 = vst.msk [vmem:[#allocation2 + $0x18] sm:$0xff] %vm73_vm2, %v102_v16  ;;  %v1270_v16 = vld [vmem:[%s1625_s3 + $0x260] sm:$0xff]  ;;  %433 = vmatpush.msrb.mxu2 %v328_v18 }
  0x80   :  { %v585_v17 = vld [vmem:[%s1629_s7] sm:$0xff] }
  0x81   :  { %v1420_v18 = vld [vmem:[%s1630_s8] sm:$0xff] }
  0x84   :  { %v87_v19 = vpop.permute.xlu0 %86  ;;  %v100_v20 = vpop.permute.xlu1 %99  ;;  %v119_v21 = vld [vmem:[#allocation2 + $0x10] sm:$0xff] }
  0x85   :  { %92 = vst.msk [vmem:[#allocation2 + $0x8] sm:$0xff] %vm59_vm1, %v87_v19  ;;  %166 = vmatpush.msra.mxu0 %v119_v21  ;;  %v303_v19 = vld [vmem:[%s1625_s3 + $0x88] sm:$0xff]  ;;  %v302_v21 = vld [vmem:[%s1625_s3 + $0x80] sm:$0xff] }
  0x86   :  { %105 = vst.msk [vmem:[#allocation2 + $0x8] sm:$0xff] %vm73_vm2, %v100_v20  ;;  %v120_v24 = vld [vmem:[#allocation2 + $0x18] sm:$0xff]  ;;  %v327_v20 = vld [vmem:[%s1625_s3 + $0x148] sm:$0xff]  ;;  %413 = vmatpush.msra.mxu3 %v303_v19 }
  0x87   :  { %167 = vmatpush.msra.mxu0 %v117_v23  ;;  %213 = vmatpush.msra.mxu1 %v120_v24  ;;  %v1294_v23 = vld [vmem:[%s1625_s3 + $0x258] sm:$0xff] }
  0x88   :  { %862 = vmatmul.msk.f32.vlgmr.msra.gmra.mxu0 %vm121_vm3, %v107_v22  ;;  %434 = vmatpush.msrb.mxu2 %v327_v20  ;;  %v325_v24 = vld [vmem:[%s1625_s3 + $0x138] sm:$0xff]  ;;  %v574_v20 = vld [vmem:[%s1623_s1 + $0x8] sm:$0xff] }
  0x89   :  { %486 = vmatpush.msrb.mxu0 %v1161_v41  ;;  %414 = vmatpush.msra.mxu3 %v302_v21  ;;  %v586_v21 = vld [vmem:[%s1629_s7 + $0x8] sm:$0xff] }
  0x8b   :  { %487 = vmatpush.msrb.mxu0 %v1228_v60 }
  0x8d   :  { %v118_v25 = vld [vmem:[#allocation2 + $0x8] sm:$0xff]  ;;  %488 = vmatpush.msrb.mxu0 %v1249_v10 }
  0x8e   :  { %214 = vmatpush.msra.mxu1 %v118_v25  ;;  %v349_v25 = vld [vmem:[%s1625_s3 + $0x1f8] sm:$0xff] }
  0x8f   :  { %872 = vmatmul.msk.f32.vlgmr.msra.gmra.mxu1 %vm121_vm3, %v107_v22  ;;  %489 = vmatpush.msrb.mxu0 %v1270_v16  ;;  %v326_v22 = vld [vmem:[%s1625_s3 + $0x140] sm:$0xff] }
  0x90   :  { %863 = vmatmul.msk.f32.gmra.mxu0 %vm121_vm3, %v108_v26  ;;  %435 = vmatpush.msrb.mxu2 %v326_v22  ;;  %v604_v22 = vld [vmem:[%s1630_s8 + $0x8] sm:$0xff] }
  0x91   :  { %490 = vmatpush.msrb.mxu0 %v1294_v23  ;;  %457 = vmatpush.msrb.mxu3 %v349_v25  ;;  %v590_v25 = vld [vmem:[%s1629_s7 + $0x28] sm:$0xff] }
  0x92   :  { %436 = vmatpush.msrb.mxu2 %v325_v24  ;;  %v589_v24 = vld [vmem:[%s1629_s7 + $0x20] sm:$0xff] }
  0x97   :  { %873 = vmatmul.msk.f32.gmra.mxu1 %vm121_vm3, %v108_v26  ;;  %v324_v26 = vld [vmem:[%s1625_s3 + $0x130] sm:$0xff] }
  0x98   :  { %864 = vmatmul.msk.f32.gmra.mxu0 %vm121_vm3, %v109_v27  ;;  %437 = vmatpush.msrb.mxu2 %v324_v26  ;;  %v580_v26 = vld [vmem:[%s1623_s1 + $0x38] sm:$0xff] }
  0x9f   :  { %874 = vmatmul.msk.f32.gmra.mxu1 %vm121_vm3, %v109_v27  ;;  %v348_v27 = vld [vmem:[%s1625_s3 + $0x1f0] sm:$0xff] }
  0xa0   :  { %865 = vmatmul.msk.f32.gmra.mxu0 %vm121_vm3, %v110_v28  ;;  %458 = vmatpush.msrb.mxu3 %v348_v27 }
  0xa7   :  { %875 = vmatmul.msk.f32.gmra.mxu1 %vm121_vm3, %v110_v28  ;;  %v1312_v28 = vld [vmem:[%s1625_s3 + $0x250] sm:$0xff] }
  0xa8   :  { %866 = vmatmul.msk.f32.gmra.mxu0 %vm121_vm3, %v111_v29 }
  0xa9   :  { %491 = vmatpush.msrb.mxu0 %v1312_v28 }
  0xab   :  { %492 = vmatpush.msrb.mxu0 %v359_v35 }
  0xad   :  { %493 = vmatpush.msrb.mxu0 %v358_v40 }
  0xaf   :  { %876 = vmatmul.msk.f32.gmra.mxu1 %vm121_vm3, %v111_v29  ;;  %v347_v29 = vld [vmem:[%s1625_s3 + $0x1e8] sm:$0xff]  ;;  %494 = vmatpush.msrb.mxu0 %v357_v47 }
  0xb0   :  { %867 = vmatmul.msk.f32.gmra.mxu0 %vm121_vm3, %v112_v30  ;;  %459 = vmatpush.msrb.mxu3 %v347_v29  ;;  %v1450_v29 = vadd.f32 %v1032_v0, %v590_v25 }
  0xb1   :  { %495 = vmatpush.msrb.mxu0 %v356_v52 }
  0xb2   :  { %460 = vmatpush.msrb.mxu3 %v346_v32  ;;  %v530_v32 = vld [vmem:[%s1627_s5 + $0x18] sm:$0xff] }
  0xb3   :  { %556 = vmatpush.msrb.mxu1 %v530_v32 }
  0xb4   :  { %461 = vmatpush.msrb.mxu3 %v345_v34 }
  0xb6   :  { %462 = vmatpush.msrb.mxu3 %v344_v37 }
  0xb7   :  { %877 = vmatmul.msk.f32.gmra.mxu1 %vm121_vm3, %v112_v30  ;;  %v323_v30 = vld [vmem:[%s1625_s3 + $0x128] sm:$0xff] }
  0xb8   :  { %868 = vmatmul.msk.f32.gmra.mxu0 %vm121_vm3, %v113_v31  ;;  %438 = vmatpush.msrb.mxu2 %v323_v30 }
  0xb9   :  { %463 = vmatpush.msrb.mxu3 %v343_v38  ;;  %v610_v38 = vmul.f32 %v604_v22, %v1450_v29 }
  0xbb   :  { %464 = vmatpush.msrb.mxu3 %v342_v43  ;;  %v632_v43 = vsel %vm531_vm4, %v610_v38, 0.0 }
  0xbd   :  { %465 = vmatpush.msrb.mxu3 %v341_v45  ;;  %v588_v45 = vld [vmem:[%s1629_s7 + $0x18] sm:$0xff] }
  0xbf   :  { %878 = vmatmul.msk.f32.gmra.mxu1 %vm121_vm3, %v113_v31  ;;  %v322_v31 = vld [vmem:[%s1625_s3 + $0x120] sm:$0xff]  ;;  %466 = vmatpush.msrb.mxu3 %v340_v46 }
  0xc0   :  { %869 = vmatmul.msk.f32.gmra.mxu0 %vm121_vm3, %v114_v39  ;;  %439 = vmatpush.msrb.mxu2 %v322_v31  ;;  %v1453_v31 = vadd.f32 %v586_v21, %v580_v26 }
  0xc1   :  { %467 = vmatpush.msrb.mxu3 %v339_v48 }
  0xc2   :  { %440 = vmatpush.msrb.mxu2 %v321_v33 }
  0xc3   :  { %468 = vmatpush.msrb.mxu3 %v338_v50  ;;  %v1488_v50 = vadd.f32 %v1050_v3, %v588_v45 }
  0xc4   :  { %441 = vmatpush.msrb.mxu2 %v320_v36 }
  0xc7   :  { %879 = vmatmul.msk.f32.gmra.mxu1 %vm121_vm3, %v114_v39  ;;  %v319_v39 = vld [vmem:[%s1625_s3 + $0x108] sm:$0xff] }
  0xc8   :  { %870 = vmatmul.msk.f32.gmra.mxu0 %vm121_vm3, %v115_v49  ;;  %442 = vmatpush.msrb.mxu2 %v319_v39  ;;  %v612_v39 = vmul.f32 %v604_v22, %v1453_v31 }
  0xca   :  { %443 = vmatpush.msrb.mxu2 %v318_v42  ;;  %v638_v46 = vsel %vm531_vm4, %v612_v39, 0.0 }
  0xcf   :  { %880 = vmatmul.msk.f32.gmra.mxu1 %vm121_vm3, %v115_v49 }
  0xd0   :  { %871 = vmatmul.msk.f32.gmra.mxu0 %vm121_vm3, %v116_v54 }
  0xd7   :  { %881 = vmatmul.msk.f32.gmra.mxu1 %vm121_vm3, %v116_v54  ;;  %v355_v54 = vld [vmem:[%s1625_s3 + $0x228] sm:$0xff] }
  0xd8   :  { %496 = vmatpush.msrb.mxu0 %v355_v54 }
  0xda   :  { %497 = vmatpush.msrb.mxu0 %v354_v59 }
  0xdc   :  { %498 = vmatpush.msrb.mxu0 %v353_v62 }
  0xde   :  { %499 = vmatpush.msrb.mxu0 %v352_v63 }
  0xe0   :  { %500 = vmatpush.msrb.mxu0 %v351_v8 }
 0x105   :  { %v169_v44 = vpop.f32.mrf.mxu0 }
 0x106   :  { %386 = vmatmul.f32.vlgmr.msra.gmra.mxu2 %v169_v44 }
 0x107   :  { %894 = vmatpush.msra.mxu2 %v1161_v41  ;;  %v337_v41 = vld [vmem:[%s1625_s3 + $0x198] sm:$0xff] }
 0x108   :  { %469 = vmatpush.msrb.mxu3 %v337_v41 }
 0x109   :  { %895 = vmatpush.msra.mxu2 %v1228_v60 }
 0x10a   :  { %470 = vmatpush.msrb.mxu3 %v336_v53 }
 0x10b   :  { %896 = vmatpush.msra.mxu2 %v1249_v10  ;;  %v350_v10 = vld [vmem:[%s1625_s3 + $0x200] sm:$0xff] }
 0x10c   :  { %v216_v49 = vpop.f32.mrf.mxu1  ;;  %471 = vmatpush.msrb.mxu3 %v335_v55  ;;  %501 = vmatpush.msrb.mxu0 %v350_v10  ;;  %v1501_v55 = vadd.f32 %v1060_v5, %v588_v45 }
 0x10d   :  { %v172_v51 = vpop.f32.mrf.mxu0  ;;  %897 = vmatpush.msra.mxu2 %v1270_v16  ;;  %v573_v16 = vld [vmem:[%s1623_s1] sm:$0xff] }
 0x10e   :  { %389 = vmatmul.f32.gmra.mxu2 %v172_v51  ;;  %472 = vmatpush.msrb.mxu3 %v334_v57  ;;  %v1422_v19 = vadd.f32 %v585_v17, %v573_v16 }
 0x10f   :  { %898 = vmatpush.msra.mxu2 %v1294_v23  ;;  %v1433_v23 = vadd.f32 %v586_v21, %v574_v20  ;;  %v920_v21 = vld [vmem:[%s1626_s4] ss:$0 sm:$0xff]  ;;  %s836_s4 = sshll.u32 %s966_s25, 4  ;;  %s837_s4 = int_to_ptr.vmem [resolvable:$true] %s836_s4 }
 0x110   :  { %v605_v27 = vmul.f32 %v1420_v18, %v1422_v19 }
 0x111   :  { %899 = vmatpush.msra.mxu2 %v1312_v28  ;;  %v1447_v28 = vadd.f32 %v1037_v1, %v589_v24  ;;  %v606_v30 = vmul.f32 %v604_v22, %v1433_v23 }
 0x112   :  { %v617_v33 = vsel %vm531_vm4, %v605_v27, 0.0 }
 0x113   :  { %900 = vmatpush.msra.mxu2 %v359_v35  ;;  %v609_v34 = vmul.f32 %v1420_v18, %v1447_v28  ;;  %618 = vadd.xlane.f32.xlu2 %v617_v33  ;;  %v620_v0 = vsel %vm531_vm4, %v606_v30, 0.0  ;;  %v1463_v35 = vadd.f32 %v1068_v6, %v589_v24  ;;  %v587_v6 = vld [vmem:[%s1629_s7 + $0x10] sm:$0xff] }
 0x114   :  { %v219_v56 = vpop.f32.mrf.mxu1  ;;  %621 = vadd.xlane.f32.xlu0 %v620_v0 }
 0x115   :  { %v175_v58 = vpop.f32.mrf.mxu0  ;;  %901 = vmatpush.msra.mxu2 %v358_v40  ;;  %v629_v37 = vsel %vm531_vm4, %v609_v34, 0.0  ;;  %v579_v40 = vld [vmem:[%s1623_s1 + $0x30] sm:$0xff]  ;;  %v615_v42 = vmul.f32 %v1420_v18, %v1463_v35 }
 0x116   :  { %392 = vmatmul.f32.gmra.mxu2 %v216_v49  ;;  %415 = vmatmul.f32.vlgmr.msra.gmra.mxu3 %v175_v58  ;;  %v1477_v44 = vadd.f32 %v585_v17, %v579_v40 }
 0x117   :  { %902 = vmatpush.msra.mxu2 %v357_v47  ;;  %910 = vmatpush.msra.mxu3 %v530_v32  ;;  %v1484_v47 = vadd.f32 %v1044_v2, %v587_v6  ;;  %v647_v49 = vsel %vm531_vm4, %v615_v42, 0.0  ;;  %v608_v2 = vmul.f32 %v604_v22, %v1488_v50 }
 0x118   :  { %630 = vadd.xlane.f32.xlu1 %v629_v37 }
 0x119   :  { %903 = vmatpush.msra.mxu2 %v356_v52  ;;  %v611_v52 = vmul.f32 %v1420_v18, %v1477_v44  ;;  %v607_v41 = vmul.f32 %v1420_v18, %v1484_v47  ;;  %v626_v57 = vsel %vm531_vm4, %v608_v2, 0.0 }
 0x11b   :  { %904 = vmatpush.msra.mxu2 %v355_v54  ;;  %633 = vadd.xlane.f32.xlu2 %v632_v43  ;;  %v635_v53 = vsel %vm531_vm4, %v611_v52, 0.0  ;;  %v1497_v54 = vadd.f32 %v1055_v4, %v590_v25  ;;  %v623_v3 = vsel %vm531_vm4, %v607_v41, 0.0 }
 0x11c   :  { %v222_v60 = vpop.f32.mrf.mxu1  ;;  %639 = vadd.xlane.f32.xlu0 %v638_v46 }
 0x11d   :  { %v178_v61 = vpop.f32.mrf.mxu0  ;;  %905 = vmatpush.msra.mxu2 %v354_v59  ;;  %v616_v59 = vmul.f32 %v604_v22, %v1497_v54 }
 0x11e   :  { %395 = vmatmul.f32.gmra.mxu2 %v219_v56  ;;  %418 = vmatmul.f32.gmra.mxu3 %v178_v61  ;;  %v1508_v61 = vadd.f32 %v1073_v7, %v587_v6 }
 0x11f   :  { %906 = vmatpush.msra.mxu2 %v353_v62  ;;  %v650_v4 = vsel %vm531_vm4, %v616_v59, 0.0 }
 0x120   :  { %648 = vadd.xlane.f32.xlu1 %v647_v49 }
 0x121   :  { %907 = vmatpush.msra.mxu2 %v352_v63  ;;  %v613_v63 = vmul.f32 %v1420_v18, %v1508_v61 }
 0x123   :  { %908 = vmatpush.msra.mxu2 %v351_v8  ;;  %636 = vadd.xlane.f32.xlu2 %v635_v53  ;;  %v641_v8 = vsel %vm531_vm4, %v613_v63, 0.0 }
 0x124   :  { %v225_v9 = vpop.f32.mrf.mxu1  ;;  %624 = vadd.xlane.f32.xlu0 %v623_v3 }
 0x125   :  { %v181_v11 = vpop.f32.mrf.mxu0  ;;  %909 = vmatpush.msra.mxu2 %v350_v10  ;;  %v528_v10 = vld [vmem:[%s1627_s5 + $0x8] sm:$0xff] }
 0x126   :  { %421 = vmatmul.f32.gmra.mxu3 %v222_v60  ;;  %444 = vmatmul.f32.vlgmr.msrb.gmra.mxu2 %v181_v11  ;;  %v614_v60 = vmul.f32 %v604_v22, %v1501_v55 }
 0x128   :  { %627 = vadd.xlane.f32.xlu1 %v626_v57  ;;  %v644_v5 = vsel %vm531_vm4, %v614_v60, 0.0 }
 0x12b   :  { %651 = vadd.xlane.f32.xlu2 %v650_v4 }
 0x12c   :  { %v228_v12 = vpop.f32.mrf.mxu1  ;;  %645 = vadd.xlane.f32.xlu0 %v644_v5 }
 0x12d   :  { %v184_v13 = vpop.f32.mrf.mxu0 }
 0x12e   :  { %424 = vmatmul.f32.gmra.mxu3 %v225_v9  ;;  %447 = vmatmul.f32.gmra.mxu2 %v184_v13  ;;  %v529_v9 = vld [vmem:[%s1627_s5 + $0x10] sm:$0xff]  ;;  %v527_v13 = vld [vmem:[%s1627_s5] sm:$0xff] }
 0x12f   :  { %557 = vmatpush.msrb.mxu1 %v529_v9  ;;  %911 = vmatpush.msra.mxu3 %v529_v9 }
 0x131   :  { %558 = vmatpush.msrb.mxu1 %v528_v10  ;;  %912 = vmatpush.msra.mxu3 %v528_v10 }
 0x133   :  { %642 = vadd.xlane.f32.xlu2 %v641_v8  ;;  %559 = vmatpush.msrb.mxu1 %v527_v13 }
 0x134   :  { %v231_v14 = vpop.f32.mrf.mxu1  ;;  %913 = vmatpush.msra.mxu3 %v527_v13 }
 0x135   :  { %v187_v15 = vpop.f32.mrf.mxu0 }
 0x136   :  { %450 = vmatmul.f32.gmra.mxu2 %v228_v12  ;;  %473 = vmatmul.f32.vlgmr.msrb.gmra.mxu3 %v187_v15 }
 0x13c   :  { %v234_v1 = vpop.f32.mrf.mxu1 }
 0x13d   :  { %v190_v36 = vpop.f32.mrf.mxu0 }
 0x13e   :  { %453 = vmatmul.f32.gmra.mxu2 %v231_v14  ;;  %476 = vmatmul.f32.gmra.mxu3 %v190_v36 }
 0x144   :  { %v237_v48 = vpop.f32.mrf.mxu1 }
 0x145   :  { %v193_v51 = vpop.f32.mrf.mxu0 }
 0x146   :  { %479 = vmatmul.f32.gmra.mxu3 %v234_v1  ;;  %502 = vmatmul.f32.vlgmr.msrb.gmra.mxu0 %v193_v51 }
 0x14c   :  { %v240_v56 = vpop.f32.mrf.mxu1 }
 0x14d   :  { %v196_v58 = vpop.f32.mrf.mxu0 }
 0x14e   :  { %482 = vmatmul.f32.gmra.mxu3 %v237_v48  ;;  %505 = vmatmul.f32.gmra.mxu0 %v196_v58 }
 0x154   :  { %v243_v62 = vpop.f32.mrf.mxu1 }
 0x155   :  { %511 = vmatmul.f32.vlgmr.msra.gmra.mxu2 %v243_v62 }
 0x156   :  { %508 = vmatmul.f32.gmra.mxu0 %v240_v56 }
 0x186   :  { %v619_v30 = vpop.xlane.xlu2 %618 }
 0x187   :  { %v622_v1 = vpop.xlane.xlu0 %621 }
 0x189   :  { %v387_v7 = vpop.f32.mrf.mxu2 }
 0x18a   :  { %v388_v24 = vadd.f32 %v920_v21, %v387_v7  ;;  %v653_v7 = vadd.f32 %v622_v1, %v619_v30 }
 0x18b   :  { %v631_v37 = vpop.xlane.xlu1 %630 }
 0x18e   :  { %v634_v46 = vpop.xlane.xlu2 %633 }
 0x18f   :  { %v640_v52 = vpop.xlane.xlu0 %639  ;;  %v667_v10 = vadd.f32 %v634_v46, %v631_v37 }
 0x191   :  { %v390_v11 = vpop.f32.mrf.mxu2 }
 0x192   :  { %v391_v0 = vadd.f32 %v920_v21, %v390_v11 }
 0x193   :  { %v649_v53 = vpop.xlane.xlu1 %648 }
 0x196   :  { %v637_v63 = vpop.xlane.xlu2 %636 }
 0x199   :  { %v416_v12 = vpop.f32.mrf.mxu3  ;;  %v393_v14 = vpop.f32.mrf.mxu2 }
 0x19a   :  { %v417_v26 = vadd.f32 %v416_v12, %v388_v24  ;;  %v394_v49 = vadd.f32 %v920_v21, %v393_v14  ;;  %v625_v12 = vpop.xlane.xlu0 %624 }
 0x1a1   :  { %v419_v15 = vpop.f32.mrf.mxu3  ;;  %v396_v16 = vpop.f32.mrf.mxu2 }
 0x1a2   :  { %v420_v38 = vadd.f32 %v419_v15, %v391_v0  ;;  %v397_v58 = vadd.f32 %v920_v21, %v396_v16  ;;  %v628_v15 = vpop.xlane.xlu1 %627  ;;  %v654_v16 = vrot.slane %v653_v7, 4  ;;  %v674_v0 = vadd.f32 %v640_v52, %v637_v63 }
 0x1a3   :  { %v660_v21 = vadd.f32 %v628_v15, %v625_v12 }
 0x1a4   :  { %v655_v24 = vadd.f32 %v654_v16, %v653_v7 }
 0x1a6   :  { %v656_v30 = vrot.slane %v655_v24, 2 }
 0x1a9   :  { %v422_v17 = vpop.f32.mrf.mxu3  ;;  %v445_v20 = vpop.f32.mrf.mxu2 }
 0x1aa   :  { %v446_v27 = vadd.f32 %v445_v20, %v417_v26  ;;  %v423_v41 = vadd.f32 %v422_v17, %v394_v49  ;;  %v668_v20 = vrot.slane %v667_v10, 4  ;;  %v652_v26 = vpop.xlane.xlu2 %651 }
 0x1ab   :  { %v688_v37 = vadd.f32 %v652_v26, %v649_v53 }
 0x1b1   :  { %v425_v18 = vpop.f32.mrf.mxu3  ;;  %v448_v25 = vpop.f32.mrf.mxu2 }
 0x1b2   :  { %v449_v6 = vadd.f32 %v448_v25, %v420_v38  ;;  %v426_v60 = vadd.f32 %v425_v18, %v397_v58  ;;  %v669_v25 = vadd.f32 %v668_v20, %v667_v10  ;;  %v643_v38 = vpop.xlane.xlu2 %642 }
 0x1b9   :  { %v474_v22 = vpop.f32.mrf.mxu3  ;;  %v451_v39 = vpop.f32.mrf.mxu2 }
 0x1ba   :  { %v475_v33 = vadd.f32 %v474_v22, %v446_v27  ;;  %v452_v3 = vadd.f32 %v451_v39, %v423_v41  ;;  %v661_v27 = vrot.slane %v660_v21, 4  ;;  %v646_v39 = vpop.xlane.xlu0 %645 }
 0x1bb   :  { %v681_v46 = vadd.f32 %v646_v39, %v643_v38 }
 0x1bd   :  { %v682_v52 = vrot.slane %v681_v46, 4 }
 0x1c1   :  { %v477_v32 = vpop.f32.mrf.mxu3  ;;  %v454_v56 = vpop.f32.mrf.mxu2 }
 0x1c2   :  { %v478_v43 = vadd.f32 %v477_v32, %v449_v6  ;;  %v455_v8 = vadd.f32 %v454_v56, %v426_v60  ;;  %v670_v32 = vrot.slane %v669_v25, 2  ;;  %v683_v60 = vadd.f32 %v682_v52, %v681_v46 }
 0x1c3   :  { %v503_v34 = vpop.f32.mrf.mxu0 }
 0x1c4   :  { %v504_v36 = vadd.f32 %v503_v34, %v475_v33  ;;  %v662_v33 = vadd.f32 %v661_v27, %v660_v21  ;;  %v657_v34 = vadd.f32 %v656_v30, %v655_v24  ;;  %v671_v1 = vadd.f32 %v670_v32, %v669_v25 }
 0x1c6   :  { %vm515_vm5 = vcmp.gt.f32.partialorder %v504_v36, 0.0  ;;  %v519_v40 = vmul.f32 0.01, %v504_v36  ;;  %v672_v6 = vrot.slane %v671_v1, 1 }
 0x1c8   :  { %v523_v42 = vsel %vm515_vm5, %v504_v36, %v519_v40  ;;  %v663_v36 = vrot.slane %v662_v33, 2  ;;  %v658_v40 = vrot.slane %v657_v34, 1 }
 0x1c9   :  { %882 = vmatmul.msk.f32.vlgmr.msrb.gmra.mxu1 %vm531_vm4, %v523_v42  ;;  %v480_v45 = vpop.f32.mrf.mxu3  ;;  %v675_v42 = vrot.slane %v674_v0, 4 }
 0x1ca   :  { %v481_v59 = vadd.f32 %v480_v45, %v452_v3  ;;  %v689_v45 = vrot.slane %v688_v37, 4  ;;  %v659_v49 = vadd.f32 %v658_v40, %v657_v34 }
 0x1cb   :  { %v506_v48 = vpop.f32.mrf.mxu0  ;;  %v676_v41 = vadd.f32 %v675_v42, %v674_v0 }
 0x1cc   :  { %v507_v51 = vadd.f32 %v506_v48, %v478_v43  ;;  %v664_v43 = vadd.f32 %v663_v36, %v662_v33  ;;  %v696_v48 = vstv %s1631_s9  ;;  %v690_v3 = vadd.f32 %v689_v45, %v688_v37 }
 0x1cd   :  { %v697_v56 = vadd.f32 %v696_v48, %v659_v49 }
 0x1ce   :  { %v520_v2 = vmul.f32 0.01, %v507_v51  ;;  %vm516_vm6 = vcmp.gt.f32.partialorder %v507_v51, 0.0 }
 0x1d0   :  { %v524_v57 = vsel %vm516_vm6, %v507_v51, %v520_v2  ;;  %v673_v51 = vadd.f32 %v672_v6, %v671_v1  ;;  %v665_v2 = vrot.slane %v664_v43, 1 }
 0x1d1   :  { %883 = vmatmul.msk.f32.gmra.mxu1 %vm531_vm4, %v524_v57  ;;  %v483_v5 = vpop.f32.mrf.mxu3  ;;  %v677_v57 = vrot.slane %v676_v41, 2 }
 0x1d2   :  { %v484_v11 = vadd.f32 %v483_v5, %v455_v8  ;;  %v699_v53 = vadd.f32 %v696_v48, %v673_v51  ;;  %v666_v58 = vadd.f32 %v665_v2, %v664_v43  ;;  %v684_v8 = vrot.slane %v683_v60, 2 }
 0x1d3   :  { %v509_v4 = vpop.f32.mrf.mxu0  ;;  %v678_v5 = vadd.f32 %v677_v57, %v676_v41 }
 0x1d4   :  { %v510_v62 = vadd.f32 %v509_v4, %v481_v59  ;;  %v691_v59 = vrot.slane %v690_v3, 2  ;;  %v703_v4 = vmax.f32 %v697_v56, %v699_v53 }
 0x1d6   :  { %v521_v9 = vmul.f32 0.01, %v510_v62  ;;  %vm517_vm7 = vcmp.gt.f32.partialorder %v510_v62, 0.0  ;;  %v692_v63 = vadd.f32 %v691_v59, %v690_v3 }
 0x1d8   :  { %v512_v13 = vpop.f32.mrf.mxu2  ;;  %v525_v14 = vsel %vm517_vm7, %v510_v62, %v521_v9  ;;  %v698_v62 = vadd.f32 %v696_v48, %v666_v58  ;;  %v679_v9 = vrot.slane %v678_v5, 1  ;;  %v693_v10 = vrot.slane %v692_v63, 1 }
 0x1d9   :  { %v513_v17 = vadd.f32 %v512_v13, %v484_v11  ;;  %884 = vmatmul.msk.f32.gmra.mxu1 %vm531_vm4, %v525_v14  ;;  %v685_v11 = vadd.f32 %v684_v8, %v683_v60 }
 0x1da   :  { %v704_v7 = vmax.f32 %v703_v4, %v698_v62  ;;  %v680_v12 = vadd.f32 %v679_v9, %v678_v5  ;;  %v694_v14 = vadd.f32 %v693_v10, %v692_v63 }
 0x1db   :  { %vm518_vm8 = vcmp.gt.f32.partialorder %v513_v17, 0.0  ;;  %v522_v18 = vmul.f32 0.01, %v513_v17  ;;  %v686_v15 = vrot.slane %v685_v11, 1 }
 0x1dc   :  { %v707_v13 = vsub.f32 %v697_v56, %v704_v7  ;;  %v700_v16 = vadd.f32 %v696_v48, %v680_v12 }
 0x1dd   :  { %v526_v22 = vsel %vm518_vm8, %v513_v17, %v522_v18  ;;  %v708_v17 = vsub.f32 %v698_v62, %v704_v7  ;;  %v702_v18 = vadd.f32 %v696_v48, %v694_v14  ;;  %v687_v21 = vadd.f32 %v686_v15, %v685_v11 }
 0x1de   :  { %885 = vmatmul.msk.f32.vlgmr.msra.gmra.mxu3 %vm531_vm4, %v526_v22  ;;  %v713_v20 = vmul.f32 1.442695, %v707_v13  ;;  %v709_v22 = vsub.f32 %v699_v53, %v704_v7 }
 0x1df   :  { %v715_v24 = vmul.f32 1.442695, %v708_v17  ;;  %v705_v25 = vmax.f32 %v700_v16, %v702_v18  ;;  %v701_v26 = vadd.f32 %v696_v48, %v687_v21 }
 0x1e0   :  { %921 = vpow2.f32 %v713_v20  ;;  %v717_v27 = vmul.f32 1.442695, %v709_v22 }
 0x1e1   :  { %923 = vpow2.f32 %v715_v24  ;;  %v706_v30 = vmax.f32 %v705_v25, %v701_v26  ;;  %v886_v24 = vld [vmem:[%s1623_s1 + $0x10] sm:$0xff]  ;;  %v887_v25 = vld [vmem:[%s1623_s1 + $0x18] sm:$0xff] }
 0x1e2   :  { %925 = vpow2.f32 %v717_v27  ;;  %817 = vst.msk [vmem:[#allocation5] sm:$0xff] %vm531_vm4, %v886_v24 }
 0x1e3   :  { %v710_v34 = vsub.f32 %v700_v16, %v706_v30  ;;  %v711_v1 = vsub.f32 %v701_v26, %v706_v30  ;;  %v712_v38 = vsub.f32 %v702_v18, %v706_v30  ;;  %v888_v26 = vld [vmem:[%s1623_s1 + $0x20] sm:$0xff]  ;;  %818 = vst.msk [vmem:[#allocation5 + $0x8] sm:$0xff] %vm531_vm4, %v887_v25 }
 0x1e4   :  { %819 = vst.msk [vmem:[#allocation5 + $0x10] sm:$0xff] %vm531_vm4, %v888_v26 }
 0x1e5   :  { %v719_v37 = vmul.f32 1.442695, %v710_v34  ;;  %v721_v39 = vmul.f32 1.442695, %v711_v1  ;;  %v723_v6 = vmul.f32 1.442695, %v712_v38 }
 0x1e6   :  { %v922_v32 = vpop.eup %921 }
 0x1e7   :  { %v924_v33 = vpop.eup %923  ;;  %927 = vpow2.f32 %v719_v37  ;;  %v891_v37 = vld [vmem:[%s1623_s1 + $0x48] sm:$0xff] }
 0x1e8   :  { %v725_v0 = vadd.f32 %v924_v33, %v922_v32  ;;  %v926_v36 = vpop.eup %925  ;;  %929 = vpow2.f32 %v721_v39  ;;  %v796_v39 = vld [vmem:[%s1628_s6 + $0x8] sm:$0xff]  ;;  %822 = vst.msk [vmem:[#allocation5 + $0x38] sm:$0xff] %vm531_vm4, %v891_v37 }
 0x1ea   :  { %v726_v40 = vadd.f32 %v926_v36, %v725_v0 }
 0x1ec   :  { %931 = vrcp.f32 %v726_v40  ;;  %vm734_vm9 = vweird.f32 %v726_v40  ;;  %v740_v3 = vand.u32 2147483648, %v726_v40  ;;  %v738_v56 = vand.u32 2147483647, %v726_v40 }
 0x1ed   :  { %933 = vpow2.f32 %v723_v6  ;;  %v928_v42 = vpop.eup %927 }
 0x1ee   :  { %v930_v43 = vpop.eup %929  ;;  %v741_v57 = vor.u32 1.1754944e-38, %v740_v3  ;;  %vm739_vm12 = vcmp.eq.f32.partialorder %v738_v56, 8.507059e+37 }
 0x1ef   :  { %v727_v46 = vadd.f32 %v930_v43, %v928_v42 }
 0x1f2   :  { %v932_v45 = vpop.eup %931 }
 0x1f3   :  { %v1533_v48 = vpop.eup %933  ;;  %v730_v49 = vmul.f32 %v932_v45, %v726_v40  ;;  %vm735_vm10 = vweird.f32 %v932_v45 }
 0x1f4   :  { %v728_v51 = vadd.f32 %v1533_v48, %v727_v46  ;;  %vm736_vm11 = vmor %vm734_vm9, %vm735_vm10 }
 0x1f5   :  { %v731_v41 = vsub.f32 1.0, %v730_v49 }
 0x1f6   :  { %935 = vrcp.f32 %v728_v51  ;;  %vm751_vm13 = vweird.f32 %v728_v51  ;;  %v757_v10 = vand.u32 2147483648, %v728_v51  ;;  %v755_v12 = vand.u32 2147483647, %v728_v51 }
 0x1f7   :  { %v732_v2 = vmul.f32 %v932_v45, %v731_v41 }
 0x1f8   :  { %v758_v17 = vor.u32 1.1754944e-38, %v757_v10  ;;  %vm756_vm0 = vcmp.eq.f32.partialorder %v755_v12, 8.507059e+37 }
 0x1f9   :  { %v733_v52 = vadd.f32 %v932_v45, %v732_v2 }
 0x1fb   :  { %v737_v58 = vsel %vm736_vm11, %v932_v45, %v733_v52  ;;  %v893_v45 = vld [vmem:[%s1623_s1 + $0x58] sm:$0xff] }
 0x1fc   :  { %v936_v53 = vpop.eup %935  ;;  %v742_v60 = vsel %vm739_vm12, %v741_v57, %v737_v58  ;;  %824 = vst.msk [vmem:[#allocation5 + $0x48] sm:$0xff] %vm531_vm4, %v893_v45 }
 0x1fd   :  { %v747_v59 = vmul.f32 %v936_v53, %v728_v51  ;;  %v743_v5 = vmul.f32 %v922_v32, %v742_v60  ;;  %v744_v62 = vmul.f32 %v924_v33, %v742_v60  ;;  %v745_v8 = vmul.f32 %v926_v36, %v742_v60 }
 0x1fe   :  { %vm752_vm14 = vweird.f32 %v936_v53 }
 0x1ff   :  { %v748_v4 = vsub.f32 1.0, %v747_v59  ;;  %v763_v9 = vmul.f32 %v743_v5, %v1422_v19  ;;  %v765_v7 = vmul.f32 %v744_v62, %v1484_v47  ;;  %vm753_vm15 = vmor %vm751_vm13, %vm752_vm14  ;;  %v767_v13 = vmul.f32 %v745_v8, %v1447_v28  ;;  %v795_v47 = vld [vmem:[%s1628_s6] sm:$0xff] }
 0x200   :  { %v764_v18 = vmul.f32 %v743_v5, %v1433_v23  ;;  %v766_v21 = vmul.f32 %v744_v62, %v1488_v50  ;;  %v768_v23 = vmul.f32 %v745_v8, %v1450_v29  ;;  %v889_v50 = vld [vmem:[%s1623_s1 + $0x28] sm:$0xff]  ;;  %v890_v29 = vld [vmem:[%s1623_s1 + $0x40] sm:$0xff] }
 0x201   :  { %v749_v63 = vmul.f32 %v936_v53, %v748_v4  ;;  %v775_v14 = vsel %vm531_vm4, %v763_v9, 0.0  ;;  %v776_v15 = vsel %vm531_vm4, %v765_v7, 0.0  ;;  %v778_v19 = vsel %vm531_vm4, %v767_v13, 0.0  ;;  %820 = vst.msk [vmem:[#allocation5 + $0x18] sm:$0xff] %vm531_vm4, %v889_v50 }
 0x202   :  { %v777_v20 = vadd.f32 %v776_v15, %v775_v14  ;;  %v780_v32 = vsel %vm531_vm4, %v764_v18, 0.0  ;;  %v781_v33 = vsel %vm531_vm4, %v766_v21, 0.0  ;;  %v783_v38 = vsel %vm531_vm4, %v768_v23, 0.0  ;;  %821 = vst.msk [vmem:[#allocation5 + $0x30] sm:$0xff] %vm531_vm4, %v890_v29 }
 0x203   :  { %v750_v11 = vadd.f32 %v936_v53, %v749_v63  ;;  %v782_v36 = vadd.f32 %v781_v33, %v780_v32 }
 0x204   :  { %v779_v27 = vadd.f32 %v778_v19, %v777_v20 }
 0x205   :  { %v754_v16 = vsel %vm753_vm15, %v936_v53, %v750_v11  ;;  %v784_v49 = vadd.f32 %v783_v38, %v782_v36 }
 0x206   :  { %v759_v22 = vsel %vm756_vm0, %v758_v17, %v754_v16 }
 0x207   :  { %v760_v34 = vmul.f32 %v928_v42, %v759_v22  ;;  %v761_v1 = vmul.f32 %v930_v43, %v759_v22  ;;  %v762_v40 = vmul.f32 %v1533_v48, %v759_v22  ;;  %v892_v43 = vld [vmem:[%s1623_s1 + $0x50] sm:$0xff] }
 0x208   :  { %823 = vst.msk [vmem:[#allocation5 + $0x40] sm:$0xff] %vm531_vm4, %v892_v43 }
 0x209   :  { %v769_v6 = vmul.f32 %v760_v34, %v1477_v44  ;;  %v771_v42 = vmul.f32 %v761_v1, %v1508_v61  ;;  %v773_v44 = vmul.f32 %v762_v40, %v1463_v35  ;;  %v770_v53 = vmul.f32 %v760_v34, %v1453_v31 }
 0x20a   :  { %v772_v57 = vmul.f32 %v761_v1, %v1501_v55  ;;  %v774_v59 = vmul.f32 %v762_v40, %v1497_v54 }
 0x20b   :  { %v785_v61 = vsel %vm531_vm4, %v769_v6, 0.0  ;;  %v786_v48 = vsel %vm531_vm4, %v771_v42, 0.0  ;;  %v788_v3 = vsel %vm531_vm4, %v773_v44, 0.0  ;;  %v790_v60 = vsel %vm531_vm4, %v770_v53, 0.0 }
 0x20c   :  { %v787_v2 = vadd.f32 %v786_v48, %v785_v61  ;;  %v791_v4 = vsel %vm531_vm4, %v772_v57, 0.0  ;;  %v793_v62 = vsel %vm531_vm4, %v774_v59, 0.0 }
 0x20d   :  { %v792_v5 = vadd.f32 %v791_v4, %v790_v60 }
 0x20e   :  { %v789_v56 = vadd.f32 %v788_v3, %v787_v2 }
 0x20f   :  { %v794_v55 = vadd.f32 %v793_v62, %v792_v5 }
 0x246   :  { %v561_v28 = vpop.f32.mrf.mxu1 }
 0x247   :  { %v797_v30 = vadd.f32 %v795_v47, %v561_v28 }
 0x249   :  { %v801_v0 = vadd.f32 %v797_v30, %v779_v27 }
 0x24b   :  { %805 = vst.msk [vmem:[%s1632_s10] sm:$0xff] %vm531_vm4, %v801_v0 }
 0x24c   :  { %826 = vst.msk [vmem:[#allocation5 + $0x20] sm:$0xff] %vm531_vm4, %v801_v0 }
 0x24e   :  { %v564_v46 = vpop.f32.mrf.mxu1 }
 0x24f   :  { %v798_v51 = vadd.f32 %v796_v39, %v564_v46 }
 0x251   :  { %v802_v41 = vadd.f32 %v798_v51, %v784_v49 }
 0x253   :  { %806 = vst.msk [vmem:[%s1632_s10 + $0x8] sm:$0xff] %vm531_vm4, %v802_v41 }
 0x254   :  { %827 = vst.msk [vmem:[#allocation5 + $0x28] sm:$0xff] %vm531_vm4, %v802_v41 }
 0x256   :  { %v567_v52 = vpop.f32.mrf.mxu1 }
 0x257   :  { %v799_v35 = vadd.f32 %v795_v47, %v567_v52 }
 0x259   :  { %v803_v58 = vadd.f32 %v799_v35, %v789_v56 }
 0x25b   :  { %807 = vst.msk [vmem:[%s1632_s10 + $0x10] sm:$0xff] %vm531_vm4, %v803_v58 }
 0x25c   :  { %828 = vst.msk [vmem:[#allocation5 + $0x50] sm:$0xff] %vm531_vm4, %v803_v58 }
 0x261   :  { %v570_v31 = vpop.f32.mrf.mxu3 }
 0x262   :  { %v800_v63 = vadd.f32 %v796_v39, %v570_v31 }
 0x264   :  { %v804_v8 = vadd.f32 %v800_v63, %v794_v55 }
 0x266   :  { %808 = vst.msk [vmem:[%s1632_s10 + $0x18] sm:$0xff] %vm531_vm4, %v804_v8 }
 0x267   :  { %829 = vst.msk [vmem:[#allocation5 + $0x58] sm:$0xff] %vm531_vm4, %v804_v8 }
 0x268   :  { %844 = dma.vmem_to_hbm [thread:$0]  %s837_s4, 1536, %s839_s26, [#allocation6], %s967_s2, %s967_s2, %s968_s29  }
 0x269   :  { %961 = dma.done.wait [#allocation6], 1536  }
 0x26a   :  { %962 = vsyncadd [#allocation6], 4294965760 }
 0x26b   :  { %851 = vsyncpa [#allocation6], 1 }

</bundles_post_ra>
